<compile_context>
chip_gen: v5e
topology: v5e:2x2
jax: 0.10.0
libtpu: 0.0.40
codegen_flags: <defaults>
</compile_context>

<pallas_src>
import math

import jax
import jax.numpy as jnp
from jax.experimental import pallas as pl
from jax.experimental.pallas import tpu as pltpu

LN_EPS = 1e-12
NUM_CLASSES = 3
HEAD_PAD = 128  # lane-dense padded width for the 3-class head


# ----------------------------- in-kernel helpers -----------------------------

def _gelu_fast(x):
    # exact port of the PyTorch gelu_fast
    return 0.5 * x * (1.0 + jnp.tanh(x * 0.7978845608 * (1.0 + 0.044715 * x * x)))


def _layernorm(x, gamma, beta):
    mu = jnp.mean(x, axis=-1, keepdims=True)
    var = jnp.mean((x - mu) ** 2, axis=-1, keepdims=True)
    return gamma * (x - mu) * jax.lax.rsqrt(var + LN_EPS) + beta


# ------------------------- encoder layer (discriminator stand-in) ------------
# One grid step processes one batch element: bf16 matmuls with f32 accumulation,
# f32 softmax / LayerNorm epilogues, pooled [CLS] row as the only output.

def encoder_layer_kernel(h_ref, bias_ref,
                         wqkv_ref, bqkv_ref, wo_ref, bo_ref,
                         ln1_g_ref, ln1_b_ref,
                         w1_ref, b1_ref, w2_ref, b2_ref,
                         ln2_g_ref, ln2_b_ref,
                         pooled_ref):
    h_bf = h_ref[...]                              # [S, H] bf16
    h = h_bf.astype(jnp.float32)                   # f32 residual path
    S, H = h.shape
    bias = bias_ref[...]                           # [1, S] f32 additive key mask

    # Fused QKV projection: one [H, 3H] bf16 MXU pass, f32 accumulation.
    qkv = jnp.dot(h_bf, wqkv_ref[...],
                  preferred_element_type=jnp.float32) + bqkv_ref[...]  # [S, 3H]
    q = qkv[:, :H]
    k = qkv[:, H:2 * H]
    v = qkv[:, 2 * H:]

    # TODO(synk): single-head attention stand-in for the external ELECTRA
    # discriminator (real config / multi-head layout is not available here).
    scale = 1.0 / math.sqrt(H)
    scores = jax.lax.dot_general(                  # q @ k^T, bf16 in / f32 acc
        q.astype(jnp.bfloat16), k.astype(jnp.bfloat16),
        dimension_numbers=(((1,), (1,)), ((), ())),
        preferred_element_type=jnp.float32) * scale
    scores = scores + bias                         # mask padded keys
    scores = scores - jnp.max(scores, axis=-1, keepdims=True)
    p = jnp.exp(scores)
    p = p * pl.reciprocal(jnp.sum(p, axis=-1, keepdims=True), approx=True)
    ctx = jnp.dot(p.astype(jnp.bfloat16), v.astype(jnp.bfloat16),
                  preferred_element_type=jnp.float32)            # [S, H]

    attn = jnp.dot(ctx.astype(jnp.bfloat16), wo_ref[...],
                   preferred_element_type=jnp.float32) + bo_ref[...]
    h1 = _layernorm(h + attn, ln1_g_ref[...], ln1_b_ref[...])

    ff = _gelu_fast(jnp.dot(h1.astype(jnp.bfloat16), w1_ref[...],
                            preferred_element_type=jnp.float32) + b1_ref[...])
    ff2 = jnp.dot(ff.astype(jnp.bfloat16), w2_ref[...],
                  preferred_element_type=jnp.float32) + b2_ref[...]
    h2 = _layernorm(h1 + ff2, ln2_g_ref[...], ln2_b_ref[...])

    # Only the pooled [CLS] row is consumed downstream -> no [B,S,H] writeback.
    pooled_ref[...] = h2[0:1, :]                   # [1, H] f32


def encoder_layer(h0_bf16, mask_bias, p):
    B, S, H = h0_bf16.shape
    weights = (p["wqkv"], p["bqkv"], p["wo"], p["bo"],
               p["ln1_g"], p["ln1_b"],
               p["w1"], p["b1"], p["w2"], p["b2"],
               p["ln2_g"], p["ln2_b"])
    in_specs = (
        [pl.BlockSpec((None, S, H), lambda b: (b, 0, 0)),      # per-batch hidden
         pl.BlockSpec((None, 1, S), lambda b: (b, 0, 0))]      # per-batch mask bias
        + [pl.BlockSpec(w.shape, lambda b: (0, 0)) for w in weights]  # resident weights
    )
    out_specs = pl.BlockSpec((None, 1, H), lambda b: (b, 0, 0))
    pooled = pl.pallas_call(
        encoder_layer_kernel,
        out_shape=jax.ShapeDtypeStruct((B, 1, H), jnp.float32),
        grid=(B,),
        in_specs=in_specs,
        out_specs=out_specs,
        compiler_params=pltpu.CompilerParams(
            dimension_semantics=("parallel",)),
    )(h0_bf16, mask_bias, *weights)
    return pooled.reshape(B, H)


# -------------------- NLIPredictions head (+ fused CrossEntropyLoss) ---------
# Head runs on a lane-dense padded width (3 real classes, 125 zero columns);
# LayerNorm statistics and log-sum-exp are computed over the 3 real classes
# only.  Loss is fused into the same pallas_call to avoid extra launches and
# HBM round-trips of tiny tensors.

def _nli_head_body(pooled_ref, w_ref, b_ref, g_ref, beta_ref):
    x = jnp.dot(pooled_ref[...].astype(jnp.bfloat16), w_ref[...],
                preferred_element_type=jnp.float32) + b_ref[...]   # [B, 128]
    x = _gelu_fast(x)
    B, C = x.shape
    cls_ids = jax.lax.broadcasted_iota(jnp.int32, (B, C), 1)
    valid = cls_ids < NUM_CLASSES
    inv_n = 1.0 / NUM_CLASSES
    mu = jnp.sum(jnp.where(valid, x, 0.0), axis=-1, keepdims=True) * inv_n
    var = jnp.sum(jnp.where(valid, (x - mu) ** 2, 0.0),
                  axis=-1, keepdims=True) * inv_n
    y = g_ref[...] * (x - mu) * jax.lax.rsqrt(var + LN_EPS) + beta_ref[...]
    y = jnp.where(valid, y, 0.0)
    return y, cls_ids, valid


def nli_head_kernel(pooled_ref, w_ref, b_ref, g_ref, beta_ref, pred_ref):
    y, _, _ = _nli_head_body(pooled_ref, w_ref, b_ref, g_ref, beta_ref)
    pred_ref[...] = y


def nli_head_loss_kernel(pooled_ref, w_ref, b_ref, g_ref, beta_ref, labels_ref,
                         pred_ref, loss_ref):
    y, cls_ids, valid = _nli_head_body(pooled_ref, w_ref, b_ref, g_ref, beta_ref)
    pred_ref[...] = y

    # CrossEntropyLoss over the 3 real classes (padding masked out).
    B = y.shape[0]
    logits = jnp.where(valid, y, -1e30)
    mx = jnp.max(logits, axis=-1, keepdims=True)
    lse = mx + jnp.log(jnp.sum(jnp.exp(logits - mx), axis=-1, keepdims=True))
    onehot = (cls_ids == labels_ref[...]).astype(jnp.float32)      # labels: [B,1]
    nll = lse - jnp.sum(onehot * y, axis=-1, keepdims=True)        # [B, 1]
    loss_ref[...] = jnp.sum(nll, axis=0, keepdims=True) * (1.0 / B)


def _vmem_specs(n):
    return [pl.BlockSpec(memory_space=pltpu.MemorySpace.VMEM) for _ in range(n)]


def nli_head(pooled, p):
    B = pooled.shape[0]
    pred_pad = pl.pallas_call(
        nli_head_kernel,
        out_shape=jax.ShapeDtypeStruct((B, HEAD_PAD), jnp.float32),
        in_specs=_vmem_specs(5),
        out_specs=pl.BlockSpec(memory_space=pltpu.MemorySpace.VMEM),
    )(pooled, p["nli_w"], p["nli_b"], p["nli_ln_g"], p["nli_ln_b"])
    return pred_pad


def nli_head_loss(pooled, p, labels):
    B = pooled.shape[0]
    labels2d = labels.astype(jnp.int32).reshape(B, 1)
    pred_pad, loss = pl.pallas_call(
        nli_head_loss_kernel,
        out_shape=(jax.ShapeDtypeStruct((B, HEAD_PAD), jnp.float32),
                   jax.ShapeDtypeStruct((1, 1), jnp.float32)),
        in_specs=_vmem_specs(6),
        out_specs=(pl.BlockSpec(memory_space=pltpu.MemorySpace.VMEM),
                   pl.BlockSpec(memory_space=pltpu.MemorySpace.VMEM)),
    )(pooled, p["nli_w"], p["nli_b"], p["nli_ln_g"], p["nli_ln_b"], labels2d)
    return pred_pad, loss


# --------------------------------- forward ------------------------------------

def electra_nli_forward(p, ids, mask, labels=None):
    """ElectraNLI.forward: (pred,) or (pred, loss)."""
    B, S = ids.shape
    # glue: embedding lookup + position embeddings (gather stays in plain JAX)
    h0 = jnp.take(p["word_emb"], ids, axis=0) + p["pos_emb"][None, :S, :]
    h0 = h0.astype(jnp.bfloat16)
    mask_bias = ((1.0 - mask.astype(jnp.float32)) * (-1e9)).reshape(B, 1, S)

    pooled = encoder_layer(h0, mask_bias, p)          # [B, H] f32 ([CLS] only)

    if labels is None:
        pred_pad = nli_head(pooled, p)
        return (pred_pad[:, :NUM_CLASSES],)
    pred_pad, loss = nli_head_loss(pooled, p, labels)
    return (pred_pad[:, :NUM_CLASSES], loss[0, 0])


# ---------------------------- deterministic params ----------------------------

def init_params(key, H, FF, V, S_max):
    ks = jax.random.split(key, 10)

    def w(k, shape):
        return jax.random.normal(k, shape, jnp.float32) * 0.02

    # fused QKV weight/bias
    wq, wk, wv = w(ks[2], (H, H)), w(ks[3], (H, H)), w(ks[4], (H, H))
    wqkv = jnp.concatenate([wq, wk, wv], axis=1)                   # [H, 3H]
    bqkv = jnp.zeros((1, 3 * H), jnp.float32)

    # NLI head padded to a lane-dense width (zero columns beyond class 3)
    nli_w = jnp.pad(w(ks[8], (H, NUM_CLASSES)),
                    ((0, 0), (0, HEAD_PAD - NUM_CLASSES)))

    return dict(
        word_emb=w(ks[0], (V, H)),
        pos_emb=w(ks[1], (S_max, H)),
        # matmul weights stored in bf16 (MXU inputs); biases/LN params in f32
        wqkv=wqkv.astype(jnp.bfloat16), bqkv=bqkv,
        wo=w(ks[5], (H, H)).astype(jnp.bfloat16),
        bo=jnp.zeros((1, H), jnp.float32),
        ln1_g=jnp.ones((1, H), jnp.float32), ln1_b=jnp.zeros((1, H), jnp.float32),
        w1=w(ks[6], (H, FF)).astype(jnp.bfloat16),
        b1=jnp.zeros((1, FF), jnp.float32),
        w2=w(ks[7], (FF, H)).astype(jnp.bfloat16),
        b2=jnp.zeros((1, H), jnp.float32),
        ln2_g=jnp.ones((1, H), jnp.float32), ln2_b=jnp.zeros((1, H), jnp.float32),
        # NLIPredictions: dense(hidden_size, 3) + BertLayerNorm(3), lane-padded
        nli_w=nli_w.astype(jnp.bfloat16),
        nli_b=jnp.zeros((1, HEAD_PAD), jnp.float32),
        nli_ln_g=jnp.ones((1, HEAD_PAD), jnp.float32),
        nli_ln_b=jnp.zeros((1, HEAD_PAD), jnp.float32),
    )


if __name__ == "__main__":
    B, S, H, FF, V = 2, 8, 32, 128, 50

    key = jax.random.PRNGKey(0)
    kp, kid = jax.random.split(key)
    params = init_params(kp, H, FF, V, S)

    ids = jax.random.randint(kid, (B, S), 0, V, dtype=jnp.int32)
    mask = jnp.ones((B, S), jnp.float32).at[1, 6:].set(0.0)
    labels = jnp.array([0, 2], jnp.int32)

    pred, loss = electra_nli_forward(params, ids, mask, labels)
    jax.block_until_ready((pred, loss))

    assert pred.shape == (B, NUM_CLASSES) and pred.dtype == jnp.float32
    assert loss.shape == () and jnp.isfinite(loss)

    # labels=None path: (pred,) only
    (pred_only,) = electra_nli_forward(params, ids, mask)
    jax.block_until_ready(pred_only)
    assert pred_only.shape == (B, NUM_CLASSES)

    print("KERNEL_OK")
</pallas_src>

<mosaic_0001>
module attributes {stable_mosaic.version = 11 : i64} {
  func.func @encoder_layer_kernel(%arg0: i32, %arg1: memref<1x8x32xbf16, #tpu.memory_space<vmem>>, %arg2: memref<1x1x8xf32, #tpu.memory_space<vmem>>, %arg3: memref<32x96xbf16, #tpu.memory_space<vmem>>, %arg4: memref<1x96xf32, #tpu.memory_space<vmem>>, %arg5: memref<32x32xbf16, #tpu.memory_space<vmem>>, %arg6: memref<1x32xf32, #tpu.memory_space<vmem>>, %arg7: memref<1x32xf32, #tpu.memory_space<vmem>>, %arg8: memref<1x32xf32, #tpu.memory_space<vmem>>, %arg9: memref<32x128xbf16, #tpu.memory_space<vmem>>, %arg10: memref<1x128xf32, #tpu.memory_space<vmem>>, %arg11: memref<128x32xbf16, #tpu.memory_space<vmem>>, %arg12: memref<1x32xf32, #tpu.memory_space<vmem>>, %arg13: memref<1x32xf32, #tpu.memory_space<vmem>>, %arg14: memref<1x32xf32, #tpu.memory_space<vmem>>, %arg15: memref<1x1x32xf32, #tpu.memory_space<vmem>>) attributes {dimension_semantics = [#tpu.dimension_semantics<parallel>], iteration_bounds = array<i64: 2>, scalar_prefetch = 0 : i64, scratch_operands = 0 : i64, tpu.core_type = #tpu.core_type<tc>, window_params = [{transform_indices = @transform_0, window_bounds = array<i64: 1, 8, 32>}, {transform_indices = @transform_1, window_bounds = array<i64: 1, 1, 8>}, {pipeline_mode = #tpu.pipeline_mode<synchronous>, transform_indices = @transform_2, window_bounds = array<i64: 32, 96>}, {pipeline_mode = #tpu.pipeline_mode<synchronous>, transform_indices = @transform_3, window_bounds = array<i64: 1, 96>}, {pipeline_mode = #tpu.pipeline_mode<synchronous>, transform_indices = @transform_4, window_bounds = array<i64: 32, 32>}, {pipeline_mode = #tpu.pipeline_mode<synchronous>, transform_indices = @transform_5, window_bounds = array<i64: 1, 32>}, {pipeline_mode = #tpu.pipeline_mode<synchronous>, transform_indices = @transform_6, window_bounds = array<i64: 1, 32>}, {pipeline_mode = #tpu.pipeline_mode<synchronous>, transform_indices = @transform_7, window_bounds = array<i64: 1, 32>}, {pipeline_mode = #tpu.pipeline_mode<synchronous>, transform_indices = @transform_8, window_bounds = array<i64: 32, 128>}, {pipeline_mode = #tpu.pipeline_mode<synchronous>, transform_indices = @transform_9, window_bounds = array<i64: 1, 128>}, {pipeline_mode = #tpu.pipeline_mode<synchronous>, transform_indices = @transform_10, window_bounds = array<i64: 128, 32>}, {pipeline_mode = #tpu.pipeline_mode<synchronous>, transform_indices = @transform_11, window_bounds = array<i64: 1, 32>}, {pipeline_mode = #tpu.pipeline_mode<synchronous>, transform_indices = @transform_12, window_bounds = array<i64: 1, 32>}, {pipeline_mode = #tpu.pipeline_mode<synchronous>, transform_indices = @transform_13, window_bounds = array<i64: 1, 32>}, {transform_indices = @transform_14, window_bounds = array<i64: 1, 1, 32>}]} {
    %c0 = arith.constant 0 : index
    %c0_0 = arith.constant 0 : index
    %c0_1 = arith.constant 0 : index
    %0 = vector.load %arg1[%c0, %c0_0, %c0_1] : memref<1x8x32xbf16, #tpu.memory_space<vmem>>, vector<1x8x32xbf16>
    %1 = vector.shape_cast %0 : vector<1x8x32xbf16> to vector<8x32xbf16>
    %2 = arith.extf %1 : vector<8x32xbf16> to vector<8x32xf32>
    %c0_2 = arith.constant 0 : index
    %c0_3 = arith.constant 0 : index
    %c0_4 = arith.constant 0 : index
    %3 = vector.load %arg2[%c0_2, %c0_3, %c0_4] : memref<1x1x8xf32, #tpu.memory_space<vmem>>, vector<1x1x8xf32>
    %4 = vector.shape_cast %3 : vector<1x1x8xf32> to vector<1x8xf32>
    %c0_5 = arith.constant 0 : index
    %c0_6 = arith.constant 0 : index
    %5 = vector.load %arg3[%c0_5, %c0_6] : memref<32x96xbf16, #tpu.memory_space<vmem>>, vector<32x96xbf16>
    %cst = arith.constant dense<0.000000e+00> : vector<8x96xf32>
    %6 = tpu.matmul %1, %5, %cst {dimension_numbers = #tpu.dot_dimension_numbers<[1], [0], [0], [1], [0, 0, 1, 1], [], []>} : vector<8x32xbf16>, vector<32x96xbf16>, vector<8x96xf32> -> vector<8x96xf32>
    %c0_7 = arith.constant 0 : index
    %c0_8 = arith.constant 0 : index
    %7 = vector.load %arg4[%c0_7, %c0_8] : memref<1x96xf32, #tpu.memory_space<vmem>>, vector<1x96xf32>
    %8 = vector.broadcast %7 : vector<1x96xf32> to vector<8x96xf32>
    %9 = arith.addf %6, %8 : vector<8x96xf32>
    %10 = vector.extract_strided_slice %9 {offsets = [0, 0], sizes = [8, 32], strides = [1, 1]} : vector<8x96xf32> to vector<8x32xf32>
    %11 = vector.extract_strided_slice %9 {offsets = [0, 32], sizes = [8, 32], strides = [1, 1]} : vector<8x96xf32> to vector<8x32xf32>
    %12 = vector.extract_strided_slice %9 {offsets = [0, 64], sizes = [8, 32], strides = [1, 1]} : vector<8x96xf32> to vector<8x32xf32>
    %13 = arith.truncf %10 : vector<8x32xf32> to vector<8x32xbf16>
    %14 = arith.truncf %11 : vector<8x32xf32> to vector<8x32xbf16>
    %cst_9 = arith.constant dense<0.000000e+00> : vector<8x8xf32>
    %15 = tpu.matmul %13, %14, %cst_9 {dimension_numbers = #tpu.dot_dimension_numbers<[1], [1], [0], [0], [0, 0, 1, 0], [], []>} : vector<8x32xbf16>, vector<8x32xbf16>, vector<8x8xf32> -> vector<8x8xf32>
    %cst_10 = arith.constant 0.176776692 : f32
    %16 = vector.broadcast %cst_10 : f32 to vector<8x8xf32>
    %17 = arith.mulf %15, %16 : vector<8x8xf32>
    %18 = vector.broadcast %4 : vector<1x8xf32> to vector<8x8xf32>
    %19 = arith.addf %17, %18 : vector<8x8xf32>
    %cst_11 = arith.constant dense<0xFF800000> : vector<8xf32>
    %20 = vector.multi_reduction <maximumf>, %19, %cst_11 [1] : vector<8x8xf32> to vector<8xf32>
    %21 = vector.shape_cast %20 : vector<8xf32> to vector<8x1xf32>
    %22 = vector.broadcast %21 : vector<8x1xf32> to vector<8x8xf32>
    %23 = arith.subf %19, %22 : vector<8x8xf32>
    %24 = math.exp %23 : vector<8x8xf32>
    %cst_12 = arith.constant dense<0.000000e+00> : vector<8xf32>
    %25 = vector.multi_reduction <add>, %24, %cst_12 [1] : vector<8x8xf32> to vector<8xf32>
    %26 = vector.shape_cast %25 : vector<8xf32> to vector<8x1xf32>
    %27 = tpu.reciprocal %26 {approx = true} : vector<8x1xf32> -> vector<8x1xf32>
    %28 = vector.broadcast %27 : vector<8x1xf32> to vector<8x8xf32>
    %29 = arith.mulf %24, %28 : vector<8x8xf32>
    %30 = arith.truncf %29 : vector<8x8xf32> to vector<8x8xbf16>
    %31 = arith.truncf %12 : vector<8x32xf32> to vector<8x32xbf16>
    %cst_13 = arith.constant dense<0.000000e+00> : vector<8x32xf32>
    %32 = tpu.matmul %30, %31, %cst_13 {dimension_numbers = #tpu.dot_dimension_numbers<[1], [0], [0], [1], [0, 0, 1, 1], [], []>} : vector<8x8xbf16>, vector<8x32xbf16>, vector<8x32xf32> -> vector<8x32xf32>
    %33 = arith.truncf %32 : vector<8x32xf32> to vector<8x32xbf16>
    %c0_14 = arith.constant 0 : index
    %c0_15 = arith.constant 0 : index
    %34 = vector.load %arg5[%c0_14, %c0_15] : memref<32x32xbf16, #tpu.memory_space<vmem>>, vector<32x32xbf16>
    %cst_16 = arith.constant dense<0.000000e+00> : vector<8x32xf32>
    %35 = tpu.matmul %33, %34, %cst_16 {dimension_numbers = #tpu.dot_dimension_numbers<[1], [0], [0], [1], [0, 0, 1, 1], [], []>} : vector<8x32xbf16>, vector<32x32xbf16>, vector<8x32xf32> -> vector<8x32xf32>
    %c0_17 = arith.constant 0 : index
    %c0_18 = arith.constant 0 : index
    %36 = vector.load %arg6[%c0_17, %c0_18] : memref<1x32xf32, #tpu.memory_space<vmem>>, vector<1x32xf32>
    %37 = vector.broadcast %36 : vector<1x32xf32> to vector<8x32xf32>
    %38 = arith.addf %35, %37 : vector<8x32xf32>
    %39 = arith.addf %2, %38 : vector<8x32xf32>
    %c0_19 = arith.constant 0 : index
    %c0_20 = arith.constant 0 : index
    %40 = vector.load %arg7[%c0_19, %c0_20] : memref<1x32xf32, #tpu.memory_space<vmem>>, vector<1x32xf32>
    %c0_21 = arith.constant 0 : index
    %c0_22 = arith.constant 0 : index
    %41 = vector.load %arg8[%c0_21, %c0_22] : memref<1x32xf32, #tpu.memory_space<vmem>>, vector<1x32xf32>
    %cst_23 = arith.constant dense<0.000000e+00> : vector<8xf32>
    %42 = vector.multi_reduction <add>, %39, %cst_23 [1] : vector<8x32xf32> to vector<8xf32>
    %43 = vector.shape_cast %42 : vector<8xf32> to vector<8x1xf32>
    %cst_24 = arith.constant 3.200000e+01 : f32
    %44 = vector.broadcast %cst_24 : f32 to vector<8x1xf32>
    %45 = arith.divf %43, %44 : vector<8x1xf32>
    %46 = vector.broadcast %45 : vector<8x1xf32> to vector<8x32xf32>
    %47 = arith.subf %39, %46 : vector<8x32xf32>
    %48 = arith.mulf %47, %47 : vector<8x32xf32>
    %cst_25 = arith.constant dense<0.000000e+00> : vector<8xf32>
    %49 = vector.multi_reduction <add>, %48, %cst_25 [1] : vector<8x32xf32> to vector<8xf32>
    %50 = vector.shape_cast %49 : vector<8xf32> to vector<8x1xf32>
    %cst_26 = arith.constant 3.200000e+01 : f32
    %51 = vector.broadcast %cst_26 : f32 to vector<8x1xf32>
    %52 = arith.divf %50, %51 : vector<8x1xf32>
    %53 = vector.broadcast %45 : vector<8x1xf32> to vector<8x32xf32>
    %54 = arith.subf %39, %53 : vector<8x32xf32>
    %55 = vector.broadcast %40 : vector<1x32xf32> to vector<8x32xf32>
    %56 = arith.mulf %55, %54 : vector<8x32xf32>
    %cst_27 = arith.constant 9.99999996E-13 : f32
    %57 = vector.broadcast %cst_27 : f32 to vector<8x1xf32>
    %58 = arith.addf %52, %57 : vector<8x1xf32>
    %59 = math.rsqrt %58 : vector<8x1xf32>
    %60 = vector.broadcast %59 : vector<8x1xf32> to vector<8x32xf32>
    %61 = arith.mulf %56, %60 : vector<8x32xf32>
    %62 = vector.broadcast %41 : vector<1x32xf32> to vector<8x32xf32>
    %63 = arith.addf %61, %62 : vector<8x32xf32>
    %64 = arith.truncf %63 : vector<8x32xf32> to vector<8x32xbf16>
    %c0_28 = arith.constant 0 : index
    %c0_29 = arith.constant 0 : index
    %65 = vector.load %arg9[%c0_28, %c0_29] : memref<32x128xbf16, #tpu.memory_space<vmem>>, vector<32x128xbf16>
    %cst_30 = arith.constant dense<0.000000e+00> : vector<8x128xf32>
    %66 = tpu.matmul %64, %65, %cst_30 {dimension_numbers = #tpu.dot_dimension_numbers<[1], [0], [0], [1], [0, 0, 1, 1], [], []>} : vector<8x32xbf16>, vector<32x128xbf16>, vector<8x128xf32> -> vector<8x128xf32>
    %c0_31 = arith.constant 0 : index
    %c0_32 = arith.constant 0 : index
    %67 = vector.load %arg10[%c0_31, %c0_32] : memref<1x128xf32, #tpu.memory_space<vmem>>, vector<1x128xf32>
    %68 = vector.broadcast %67 : vector<1x128xf32> to vector<8x128xf32>
    %69 = arith.addf %66, %68 : vector<8x128xf32>
    %cst_33 = arith.constant 5.000000e-01 : f32
    %70 = vector.broadcast %cst_33 : f32 to vector<8x128xf32>
    %71 = arith.mulf %70, %69 : vector<8x128xf32>
    %cst_34 = arith.constant 0.797884583 : f32
    %72 = vector.broadcast %cst_34 : f32 to vector<8x128xf32>
    %73 = arith.mulf %69, %72 : vector<8x128xf32>
    %cst_35 = arith.constant 4.471500e-02 : f32
    %74 = vector.broadcast %cst_35 : f32 to vector<8x128xf32>
    %75 = arith.mulf %74, %69 : vector<8x128xf32>
    %76 = arith.mulf %75, %69 : vector<8x128xf32>
    %cst_36 = arith.constant 1.000000e+00 : f32
    %77 = vector.broadcast %cst_36 : f32 to vector<8x128xf32>
    %78 = arith.addf %77, %76 : vector<8x128xf32>
    %79 = arith.mulf %73, %78 : vector<8x128xf32>
    %80 = math.tanh %79 : vector<8x128xf32>
    %cst_37 = arith.constant 1.000000e+00 : f32
    %81 = vector.broadcast %cst_37 : f32 to vector<8x128xf32>
    %82 = arith.addf %81, %80 : vector<8x128xf32>
    %83 = arith.mulf %71, %82 : vector<8x128xf32>
    %84 = arith.truncf %83 : vector<8x128xf32> to vector<8x128xbf16>
    %c0_38 = arith.constant 0 : index
    %c0_39 = arith.constant 0 : index
    %85 = vector.load %arg11[%c0_38, %c0_39] : memref<128x32xbf16, #tpu.memory_space<vmem>>, vector<128x32xbf16>
    %cst_40 = arith.constant dense<0.000000e+00> : vector<8x32xf32>
    %86 = tpu.matmul %84, %85, %cst_40 {dimension_numbers = #tpu.dot_dimension_numbers<[1], [0], [0], [1], [0, 0, 1, 1], [], []>} : vector<8x128xbf16>, vector<128x32xbf16>, vector<8x32xf32> -> vector<8x32xf32>
    %c0_41 = arith.constant 0 : index
    %c0_42 = arith.constant 0 : index
    %87 = vector.load %arg12[%c0_41, %c0_42] : memref<1x32xf32, #tpu.memory_space<vmem>>, vector<1x32xf32>
    %88 = vector.broadcast %87 : vector<1x32xf32> to vector<8x32xf32>
    %89 = arith.addf %86, %88 : vector<8x32xf32>
    %90 = arith.addf %63, %89 : vector<8x32xf32>
    %c0_43 = arith.constant 0 : index
    %c0_44 = arith.constant 0 : index
    %91 = vector.load %arg13[%c0_43, %c0_44] : memref<1x32xf32, #tpu.memory_space<vmem>>, vector<1x32xf32>
    %c0_45 = arith.constant 0 : index
    %c0_46 = arith.constant 0 : index
    %92 = vector.load %arg14[%c0_45, %c0_46] : memref<1x32xf32, #tpu.memory_space<vmem>>, vector<1x32xf32>
    %cst_47 = arith.constant dense<0.000000e+00> : vector<8xf32>
    %93 = vector.multi_reduction <add>, %90, %cst_47 [1] : vector<8x32xf32> to vector<8xf32>
    %94 = vector.shape_cast %93 : vector<8xf32> to vector<8x1xf32>
    %cst_48 = arith.constant 3.200000e+01 : f32
    %95 = vector.broadcast %cst_48 : f32 to vector<8x1xf32>
    %96 = arith.divf %94, %95 : vector<8x1xf32>
    %97 = vector.broadcast %96 : vector<8x1xf32> to vector<8x32xf32>
    %98 = arith.subf %90, %97 : vector<8x32xf32>
    %99 = arith.mulf %98, %98 : vector<8x32xf32>
    %cst_49 = arith.constant dense<0.000000e+00> : vector<8xf32>
    %100 = vector.multi_reduction <add>, %99, %cst_49 [1] : vector<8x32xf32> to vector<8xf32>
    %101 = vector.shape_cast %100 : vector<8xf32> to vector<8x1xf32>
    %cst_50 = arith.constant 3.200000e+01 : f32
    %102 = vector.broadcast %cst_50 : f32 to vector<8x1xf32>
    %103 = arith.divf %101, %102 : vector<8x1xf32>
    %104 = vector.broadcast %96 : vector<8x1xf32> to vector<8x32xf32>
    %105 = arith.subf %90, %104 : vector<8x32xf32>
    %106 = vector.broadcast %91 : vector<1x32xf32> to vector<8x32xf32>
    %107 = arith.mulf %106, %105 : vector<8x32xf32>
    %cst_51 = arith.constant 9.99999996E-13 : f32
    %108 = vector.broadcast %cst_51 : f32 to vector<8x1xf32>
    %109 = arith.addf %103, %108 : vector<8x1xf32>
    %110 = math.rsqrt %109 : vector<8x1xf32>
    %111 = vector.broadcast %110 : vector<8x1xf32> to vector<8x32xf32>
    %112 = arith.mulf %107, %111 : vector<8x32xf32>
    %113 = vector.broadcast %92 : vector<1x32xf32> to vector<8x32xf32>
    %114 = arith.addf %112, %113 : vector<8x32xf32>
    %115 = vector.extract_strided_slice %114 {offsets = [0, 0], sizes = [1, 32], strides = [1, 1]} : vector<8x32xf32> to vector<1x32xf32>
    %c0_52 = arith.constant 0 : index
    %c0_53 = arith.constant 0 : index
    %c0_54 = arith.constant 0 : index
    %116 = vector.load %arg15[%c0_52, %c0_53, %c0_54] : memref<1x1x32xf32, #tpu.memory_space<vmem>>, vector<1x1x32xf32>
    %117 = vector.shape_cast %116 : vector<1x1x32xf32> to vector<1x32xf32>
    %118 = vector.shape_cast %115 : vector<1x32xf32> to vector<1x1x32xf32>
    tpu.vector_store %arg15[%c0_52, %c0_53, %c0_54], %118 {strides = array<i32>} : memref<1x1x32xf32, #tpu.memory_space<vmem>>, vector<1x1x32xf32>,
    return
  }
  func.func @transform_0(%arg0: i32) -> (i32, i32, i32) {
    %c0_i32 = arith.constant 0 : i32
    %c0_i32_0 = arith.constant 0 : i32
    %c0_i32_1 = arith.constant 0 : i32
    return %arg0, %c0_i32, %c0_i32_0 : i32, i32, i32
  }
  func.func @transform_1(%arg0: i32) -> (i32, i32, i32) {
    %c0_i32 = arith.constant 0 : i32
    %c0_i32_0 = arith.constant 0 : i32
    %c0_i32_1 = arith.constant 0 : i32
    return %arg0, %c0_i32, %c0_i32_0 : i32, i32, i32
  }
  func.func @transform_2(%arg0: i32) -> (i32, i32) {
    %c0_i32 = arith.constant 0 : i32
    %c0_i32_0 = arith.constant 0 : i32
    %c0_i32_1 = arith.constant 0 : i32
    return %c0_i32, %c0_i32_0 : i32, i32
  }
  func.func @transform_3(%arg0: i32) -> (i32, i32) {
    %c0_i32 = arith.constant 0 : i32
    %c0_i32_0 = arith.constant 0 : i32
    %c0_i32_1 = arith.constant 0 : i32
    return %c0_i32, %c0_i32_0 : i32, i32
  }
  func.func @transform_4(%arg0: i32) -> (i32, i32) {
    %c0_i32 = arith.constant 0 : i32
    %c0_i32_0 = arith.constant 0 : i32
    %c0_i32_1 = arith.constant 0 : i32
    return %c0_i32, %c0_i32_0 : i32, i32
  }
  func.func @transform_5(%arg0: i32) -> (i32, i32) {
    %c0_i32 = arith.constant 0 : i32
    %c0_i32_0 = arith.constant 0 : i32
    %c0_i32_1 = arith.constant 0 : i32
    return %c0_i32, %c0_i32_0 : i32, i32
  }
  func.func @transform_6(%arg0: i32) -> (i32, i32) {
    %c0_i32 = arith.constant 0 : i32
    %c0_i32_0 = arith.constant 0 : i32
    %c0_i32_1 = arith.constant 0 : i32
    return %c0_i32, %c0_i32_0 : i32, i32
  }
  func.func @transform_7(%arg0: i32) -> (i32, i32) {
    %c0_i32 = arith.constant 0 : i32
    %c0_i32_0 = arith.constant 0 : i32
    %c0_i32_1 = arith.constant 0 : i32
    return %c0_i32, %c0_i32_0 : i32, i32
  }
  func.func @transform_8(%arg0: i32) -> (i32, i32) {
    %c0_i32 = arith.constant 0 : i32
    %c0_i32_0 = arith.constant 0 : i32
    %c0_i32_1 = arith.constant 0 : i32
    return %c0_i32, %c0_i32_0 : i32, i32
  }
  func.func @transform_9(%arg0: i32) -> (i32, i32) {
    %c0_i32 = arith.constant 0 : i32
    %c0_i32_0 = arith.constant 0 : i32
    %c0_i32_1 = arith.constant 0 : i32
    return %c0_i32, %c0_i32_0 : i32, i32
  }
  func.func @transform_10(%arg0: i32) -> (i32, i32) {
    %c0_i32 = arith.constant 0 : i32
    %c0_i32_0 = arith.constant 0 : i32
    %c0_i32_1 = arith.constant 0 : i32
    return %c0_i32, %c0_i32_0 : i32, i32
  }
  func.func @transform_11(%arg0: i32) -> (i32, i32) {
    %c0_i32 = arith.constant 0 : i32
    %c0_i32_0 = arith.constant 0 : i32
    %c0_i32_1 = arith.constant 0 : i32
    return %c0_i32, %c0_i32_0 : i32, i32
  }
  func.func @transform_12(%arg0: i32) -> (i32, i32) {
    %c0_i32 = arith.constant 0 : i32
    %c0_i32_0 = arith.constant 0 : i32
    %c0_i32_1 = arith.constant 0 : i32
    return %c0_i32, %c0_i32_0 : i32, i32
  }
  func.func @transform_13(%arg0: i32) -> (i32, i32) {
    %c0_i32 = arith.constant 0 : i32
    %c0_i32_0 = arith.constant 0 : i32
    %c0_i32_1 = arith.constant 0 : i32
    return %c0_i32, %c0_i32_0 : i32, i32
  }
  func.func @transform_14(%arg0: i32) -> (i32, i32, i32) {
    %c0_i32 = arith.constant 0 : i32
    %c0_i32_0 = arith.constant 0 : i32
    %c0_i32_1 = arith.constant 0 : i32
    return %arg0, %c0_i32, %c0_i32_0 : i32, i32, i32
  }
}

</mosaic_0001>

<bundles_post_ra>
// kernel: tpu_custom_call.1
= control target key start
LH: loop header
LB: loop body
LE: loop exit
PB: predicated region body
PF: predicated region fallthrough
CT: control target
= control target key end

     0   :  { %s1356_s0 = inlined_call_operand.vmem [shape: bf16[2,8,32], index: 0, kind: input, shape index: {}]   ;;  %s1357_s1 = inlined_call_operand.vmem [shape: f32[2,1,8], index: 1, kind: input, shape index: {}]   ;;  %s1358_s2 = inlined_call_operand.vmem [shape: bf16[32,96], index: 2, kind: input, shape index: {}]   ;;  %s1359_s3 = inlined_call_operand.vmem [shape: f32[1,96], index: 3, kind: input, shape index: {}]   ;;  %s1360_s4 = inlined_call_operand.vmem [shape: bf16[32,32], index: 4, kind: input, shape index: {}]   ;;  %s1361_s5 = inlined_call_operand.vmem [shape: f32[1,32], index: 5, kind: input, shape index: {}]   ;;  %s1362_s6 = inlined_call_operand.vmem [shape: f32[1,32], index: 6, kind: input, shape index: {}]   ;;  %s1363_s7 = inlined_call_operand.vmem [shape: f32[1,32], index: 7, kind: input, shape index: {}]   ;;  %s1364_s8 = inlined_call_operand.vmem [shape: bf16[32,128], index: 8, kind: input, shape index: {}]   ;;  %s1365_s9 = inlined_call_operand.vmem [shape: f32[1,128], index: 9, kind: input, shape index: {}]   ;;  %s1366_s10 = inlined_call_operand.vmem [shape: bf16[128,32], index: 10, kind: input, shape index: {}]   ;;  %s1367_s11 = inlined_call_operand.vmem [shape: f32[1,32], index: 11, kind: input, shape index: {}]   ;;  %s1368_s12 = inlined_call_operand.vmem [shape: f32[1,32], index: 12, kind: input, shape index: {}]   ;;  %s1369_s13 = inlined_call_operand.vmem [shape: f32[1,32], index: 13, kind: input, shape index: {}]   ;;  %s1370_s14 = inlined_call_operand.hbm [shape: f32[2,1,32], index: 14, kind: output, shape index: {}]  }
   0x1   :  { %1372 = sst [smem:[#allocation7_spill]] %s1356_s0 }
   0x2   :  { %1373 = sst [smem:[#allocation8_spill]] %s1357_s1 }
   0x3   :  { %19 = vsyncpa [#allocation3], 0 }
   0x4   :  { %21 = vsyncpa [#allocation3 + $0x1], 0  ;;  %s1184_s29 = smov 0   ;;  %s1186_s30 = smov 0  }
   0x5   :  { %s1188_s15 = smov 0   ;;  %s1190_s16 = smov 0  }
   0x6 LB: > { %1374 = sst [smem:[#allocation5_spill]] %s1100_s15  ;;  %s1205_s17 = sadd.s32 4294967295, %s1104_s16   ;;  %s1104_s16 = sphi %s1190_s16, %s1384_s16   ;;  %s1100_s15 = sphi %s1188_s15, %s1381_s15   ;;  %s1096_s30 = sphi %s1186_s30, %s1383_s30   ;;  %s1092_s29 = sphi %s1184_s29, %s1382_s29  }
   0x7   : > { %s897_s18 = sadd.s32 4294967294, %s1104_s16   ;;  %s1209_s19 = sadd.s32 1, %s1104_s16  }
   0x8   : > { %s338_s20 = sadd.s32 1, %s1100_s15  ;;  %s335_s21 = ssub.s32 %s1104_s16, %s1209_s19 }
   0x9   : > { %p348_p0 = scmp.ne.s32.totalorder %s1100_s15, %s1096_s30  ;;  %p336_p1 = scmp.eq.s32.totalorder %s335_s21, 0 }
   0xa   : > { %p349_p2 = scmp.eq.s32.totalorder %s1205_s17, 1  ;;  %p354_p3 = scmp.ne.s32.totalorder %s1096_s30, %s1092_s29 }
   0xb   : > { %p355_p4 = scmp.eq.s32.totalorder %s897_s18, 1  ;;  %p900_p7 = scmp.ge.s32.totalorder %s1104_s16, 1 }
   0xc   : > { %s1220_s22 = scalar_select %p336_p1, %s1100_s15, %s338_s20  }
   0xd   : > { %p1222_p5 = por %p349_p2, %p348_p0  ;;  %p1226_p6 = por %p355_p4, %p354_p3 }
   0xe   : > { %1375 = sst [smem:[#allocation6_spill]] %s1220_s22  ;;  %p422_p8 = scmp.lt.s32.totalorder %s1104_s16, 3 }
  0x10   : > { %p423_p9 = pnand %p900_p7, %p422_p8 }
  0x11   : > { %p469_p10 = scmp.lt.s32.totalorder (!%p423_p9), %s1205_s17, 1  ;;  %s1378_s0 = sld [smem:[#allocation7_spill]] (!%p423_p9) }
  0x12   : > { %426 = sbr.rel (%p423_p9) target bundleno = 1779 (0x6f3), region = 76  ;;  %s1106_s27 = smov (!%p423_p9), 96  }
  0x13   : > { %s1379_s1 = sld [smem:[#allocation8_spill]] (!%p423_p9)  ;;  %s467_s22 = sand.u32 (!%p423_p9), 1, %s1096_s30  }
  0x14   : > { %s829_s21 = scalar_lea.hbm (!%p423_p9), %s1370_s14, %s1205_s17  ;;  %s1062_s26 = scalar_lea.hbm (!%p423_p9), %s1370_s14, 2 }
  0x15   : > { %s833_s28 = sshll.u32 (!%p423_p9), %s829_s21, 4  ;;  %s834_s28 = int_to_ptr.hbm [resolvable:$true] %s833_s28 }
  0x17   : > { %v966_v0 = vld [vmem:[%s1358_s2 + $0x8] sm:$0xff]  ;;  %v965_v1 = vld [vmem:[%s1358_s2] sm:$0xff]  ;;  %s470_s18 = scalar_select %p469_p10, %s1205_s17, 1  ;;  %vm500_vm0 = vcmask 261120   ;;  %vm545_vm1 = vcmask 64512   ;;  %vm563_vm2 = vcmask 1043456  }
  0x18   : > { %510 = vmatpush.bf16.msra.mxu1 %v966_v0  ;;  %v1021_v3 = vld [vmem:[%s1359_s3] ss:$0 sm:$0xff]  ;;  %v968_v21 = vld [vmem:[%s1360_s4 + $0x8] sm:$0xff]  ;;  %v1108_v39 = vmov 32.0   ;;  %v978_v53 = vld [vmem:[%s1366_s10 + $0x38] sm:$0xff]  ;;  %vm818_vm10 = vcmask 253952  }
  0x19   : > { %s901_s20 = sshll.u32 %s470_s18, 2  ;;  %610 = vmatpush.bf16.msra.mxu3 %v968_v21  ;;  %v967_v28 = vld [vmem:[%s1360_s4] sm:$0xff]  ;;  %v970_v51 = vld [vmem:[%s1364_s8 + $0x8] sm:$0xff]  ;;  %772 = vmatpush.bf16.msra.mxu0 %v978_v53  ;;  %v977_v54 = vld [vmem:[%s1366_s10 + $0x30] sm:$0xff]  ;;  %s821_s17 = scalar_lea.sflag [#allocation3], %s467_s22 }
  0x1a   : > { %s472_s15 = scalar_lea.vmem %s1378_s0, %s901_s20  ;;  %v1023_v32 = vld [vmem:[%s1361_s5] ss:$0 sm:$0xff]  ;;  %s468_s0 = scalar_lea.vmem [#allocation2], %s467_s22 }
  0x1b   : > { %v477_v2 = vld [vmem:[%s472_s15] sm:$0xf]  ;;  %s475_s15 = scalar_lea.vmem %s1379_s1, %s470_s18  ;;  %s1107_s18 = smov 64  }
  0x1c   : > { %511 = vmatpush.bf16.msra.mxu1 %v965_v1  ;;  %v1022_v10 = vld [vmem:[%s475_s15] ss:$0 sm:$0xff]  ;;  %v478_v33 = vunpack.c.l.bf16 %v477_v2  ;;  %s1056_s15 = sshra.s32 %s834_s28, 4  ;;  %s1057_s15 = int_to_ptr.hbm [resolvable:$true] %s1056_s15 }
  0x1d   : > { %611 = vmatpush.bf16.msra.mxu3 %v967_v28  ;;  %v969_v52 = vld [vmem:[%s1364_s8] sm:$0xff]  ;;  %773 = vmatpush.bf16.msra.mxu0 %v977_v54  ;;  %p1063_p0 = scmp.lt.s32.totalorder %s1057_s15, %s1370_s14 }
  0x1e   : > { %v1024_v62 = vld [vmem:[%s1362_s6] ss:$0 sm:$0xff] }
  0x1f   : > { %910 = vmatmul.msk.bf16.vlgmr.msra.gmra.mxu1 %vm500_vm0, %v477_v2  ;;  %v1025_v2 = vld [vmem:[%s1363_s7] ss:$0 sm:$0xff] }
  0x9c   : > { %v513_v4 = vpop.f32.mrf.mxu1 }
  0x9d   : > { %v514_v5 = vadd.f32 %v1021_v3, %v513_v4 }
  0x9f   : > { %v517_v6 = vpack.c.bf16 %v514_v5, %v514_v5 }
  0xa1   : > { %519 = vrot.lane.b32.xlu0 %v517_v6, %s1106_s27  ;;  %s831_s27 = sshll.u32 %s468_s0, 4  ;;  %s832_s27 = int_to_ptr.vmem [resolvable:$true] %s831_s27 }
  0xa4   : > { %v515_v7 = vpop.f32.mrf.mxu1 }
  0xa5   : > { %v976_v7 = vld [vmem:[%s1366_s10 + $0x28] sm:$0xff] }
  0xa6   : > { %774 = vmatpush.bf16.msra.mxu0 %v976_v7 }
 0x113   : > { %v520_v8 = vpop.permute.xlu0 %519 }
 0x114   : > { %v525_v9 = vsel %vm500_vm0, %v520_v8, 0  ;;  %v975_v8 = vld [vmem:[%s1366_s10 + $0x20] sm:$0xff] }
 0x115   : > { %534 = vmatpush.bf16.xpose.msrb.mxu1 %v525_v9  ;;  %775 = vmatpush.bf16.msra.mxu0 %v975_v8  ;;  %v974_v9 = vld [vmem:[%s1366_s10 + $0x18] sm:$0xff] }
 0x119   : > { %776 = vmatpush.bf16.msra.mxu0 %v974_v9 }
 0x11c   : > { %911 = vmatmul.msk.bf16.vlgmr.msrb.gmra.mxu1 %vm500_vm0, %v517_v6 }
 0x199   : > { %v536_v11 = vpop.f32.mrf.mxu1 }
 0x19a   : > { %v540_v12 = vmul.f32 0.17677669, %v536_v11  ;;  %v972_v11 = vld [vmem:[%s1366_s10 + $0x8] sm:$0xff] }
 0x19c   : > { %v544_v13 = vadd.f32 %v1022_v10, %v540_v12  ;;  %v973_v10 = vld [vmem:[%s1366_s10 + $0x10] sm:$0xff]  ;;  %v971_v12 = vld [vmem:[%s1366_s10] sm:$0xff] }
 0x19d   : > { %777 = vmatpush.bf16.msra.mxu0 %v973_v10 }
 0x19e   : > { %v546_v14 = vsel %vm545_vm1, %v544_v13, -inf }
 0x19f   : > { %547 = vmax.xlane.f32.xlu0 %v546_v14 }
 0x1a1   : > { %v538_v15 = vpop.f32.mrf.mxu1  ;;  %778 = vmatpush.bf16.msra.mxu0 %v972_v11 }
 0x1a5   : > { %779 = vmatpush.bf16.msra.mxu0 %v971_v12 }
 0x212   : > { %v548_v16 = vpop.xlane.xlu0 %547 }
 0x213   : > { %v549_v17 = vsub.f32 %v544_v13, %v548_v16  ;;  %v1026_v13 = vld [vmem:[%s1365_s9] ss:$0 sm:$0xff] }
 0x215   : > { %v550_v18 = vmul.f32 1.442695, %v549_v17 }
 0x217   : > { %1030 = vpow2.f32 %v550_v18 }
 0x21d   : > { %v1031_v19 = vpop.eup %1030 }
 0x21e   : > { %v552_v20 = vsel %vm545_vm1, %v1031_v19, 0.0 }
 0x21f   : > { %553 = vadd.xlane.f32.xlu1 %v552_v20 }
 0x238   : > { %558 = vrot.lane.b32.xlu1 %v517_v6, %s1107_s18  ;;  %s1058_s18 = scalar_lea.hbm %s1057_s15, 1 }
 0x239   : > { %p1059_p11 = scmp.ne.s32.totalorder %s1057_s15, %s1058_s18  ;;  %p1064_p1 = scmp.lt.s32.totalorder %s1062_s26, %s1058_s18 }
 0x23b   : > { %p1060_p12 = pnand %p1059_p11, %p1222_p5  ;;  %p1065_p2 = por %p1064_p1, %p1063_p0 }
 0x23d   : > { %p1061_p13 = pneg %p1060_p12 }
 0x23f   : > { %p1066_p3 = pnand %p1065_p2, %p1061_p13 }
 0x292   : > { %v554_v22 = vpop.xlane.xlu1 %553 }
 0x293   : > { %1032 = vrcp.f32 %v554_v22 }
 0x294   : > { %1034 = vrcp.f32 %v1108_v39 }
 0x299   : > { %v1033_v23 = vpop.eup %1032 }
 0x29a   : > { %v556_v24 = vmul.f32 %v1033_v23, %v1031_v19  ;;  %v1035_v40 = vpop.eup %1034 }
 0x29b   : > { %v624_v41 = vmul.f32 32.0, %v1035_v40  ;;  %vm628_vm3 = vweird.f32 %v1035_v40 }
 0x29c   : > { %v557_v27 = vpack.c.bf16 %v556_v24, %v556_v24 }
 0x29d   : > { %v625_v42 = vsub.f32 1.0, %v624_v41 }
 0x29f   : > { %v626_v43 = vmul.f32 %v1035_v40, %v625_v42 }
 0x2a1   : > { %v627_v44 = vadd.f32 %v1035_v40, %v626_v43 }
 0x2a3   : > { %v1266_v45 = vsel %vm628_vm3, %v1035_v40, %v627_v44 }
 0x2aa   : > { %v559_v25 = vpop.permute.xlu1 %558 }
 0x2ab   : > { %v565_v26 = vsel %vm563_vm2, %v559_v25, 0 }
 0x2ac   : > { %574 = vmatpush.bf16.msra.mxu2 %v565_v26 }
 0x2af   : > { %912 = vmatmul.msk.bf16.vlgmr.msra.gmra.mxu2 %vm545_vm1, %v557_v27  ;;  %v1027_v27 = vld [vmem:[%s1367_s11] ss:$0 sm:$0xff] }
 0x2b0   : > { %687 = vmatpush.bf16.msrb.mxu2 %v970_v51 }
 0x2b4   : > { %688 = vmatpush.bf16.msrb.mxu2 %v969_v52 }
 0x332   : > { %v576_v29 = vpop.f32.mrf.mxu2 }
 0x333   : > { %v580_v30 = vpack.c.bf16 %v576_v29, %v576_v29 }
 0x335   : > { %921 = vmatmul.msk.bf16.vlgmr.msra.gmra.mxu3 %vm500_vm0, %v580_v30 }
 0x33a   : > { %v578_v31 = vpop.f32.mrf.mxu2 }
 0x3b8   : > { %v613_v34 = vpop.f32.mrf.mxu3 }
 0x3b9   : > { %v614_v35 = vadd.f32 %v1023_v32, %v613_v34 }
 0x3bb   : > { %v617_v36 = vadd.f32 %v614_v35, %v478_v33 }
 0x3bd   : > { %v620_v37 = vsel %vm500_vm0, %v617_v36, 0.0 }
 0x3be   : > { %621 = vadd.xlane.f32.xlu2 %v620_v37 }
 0x3c0   : > { %v615_v38 = vpop.f32.mrf.mxu3 }
 0x431   : > { %v622_v46 = vpop.xlane.xlu2 %621 }
 0x432   : > { %v630_v47 = vmul.f32 %v1266_v45, %v622_v46  ;;  %v1028_v46 = vld [vmem:[%s1368_s12] ss:$0 sm:$0xff] }
 0x434   : > { %v631_v48 = vsub.f32 %v617_v36, %v630_v47 }
 0x436   : > { %v632_v49 = vmul.f32 %v631_v48, %v631_v48  ;;  %v640_v1 = vmul.f32 %v1024_v62, %v631_v48 }
 0x438   : > { %v633_v50 = vsel %vm500_vm0, %v632_v49, 0.0  ;;  %v1029_v49 = vld [vmem:[%s1369_s13] ss:$0 sm:$0xff] }
 0x439   : > { %634 = vadd.xlane.f32.xlu2 %v633_v50 }
 0x4ac   : > { %v635_v55 = vpop.xlane.xlu2 %634 }
 0x4ad   : > { %v636_v56 = vmul.f32 %v635_v55, %v1266_v45 }
 0x4af   : > { %v641_v57 = vadd.f32 1e-12, %v636_v56 }
 0x4b1   : > { %1036 = vrsqrt.f32 %v641_v57  ;;  %vm648_vm5 = vweird.f32 %v641_v57 }
 0x4b7   : > { %v1037_v58 = vpop.eup %1036 }
 0x4b8   : > { %v643_v59 = vmul.f32 %v1037_v58, %v641_v57  ;;  %vm649_vm4 = vweird.f32 %v1037_v58 }
 0x4b9   : > { %vm650_vm6 = vmor %vm648_vm5, %vm649_vm4 }
 0x4ba   : > { %v644_v60 = vmul.f32 %v1037_v58, %v643_v59 }
 0x4bc   : > { %v645_v61 = vmul.f32 0.5, %v644_v60 }
 0x4be   : > { %v646_v63 = vsub.f32 1.5, %v645_v61 }
 0x4c0   : > { %v647_v0 = vmul.f32 %v1037_v58, %v646_v63 }
 0x4c2   : > { %v651_v3 = vsel %vm650_vm6, %v1037_v58, %v647_v0 }
 0x4c3   : > { %v652_v4 = vmul.f32 %v651_v3, %v640_v1 }
 0x4c5   : > { %v656_v5 = vadd.f32 %v1025_v2, %v652_v4 }
 0x4c7   : > { %v657_v6 = vpack.c.bf16 %v656_v5, %v656_v5 }
 0x4c9   : > { %930 = vmatmul.msk.bf16.vlgmr.msrb.gmra.mxu2 %vm500_vm0, %v657_v6 }
 0x54c   : > { %v690_v14 = vpop.f32.mrf.mxu2 }
 0x54d   : > { %v691_v15 = vadd.f32 %v1026_v13, %v690_v14 }
 0x54f   : > { %v696_v16 = vmul.f32 0.044715, %v691_v15  ;;  %v695_v18 = vmul.f32 0.7978846, %v691_v15  ;;  %v694_v23 = vmul.f32 0.5, %v691_v15 }
 0x551   : > { %v697_v17 = vmul.f32 %v696_v16, %v691_v15 }
 0x553   : > { %v698_v19 = vadd.f32 1.0, %v697_v17 }
 0x554   : > { %v692_v20 = vpop.f32.mrf.mxu2 }
 0x555   : > { %v699_v21 = vmul.f32 %v698_v19, %v695_v18 }
 0x557   : > { %1038 = vtanh.f32 %v699_v21 }
 0x55d   : > { %v1039_v22 = vpop.eup %1038 }
 0x55e   : > { %v701_v24 = vadd.f32 1.0, %v1039_v22 }
 0x560   : > { %v702_v25 = vmul.f32 %v701_v24, %v694_v23 }
 0x562   : > { %v703_v26 = vpack.c.bf16 %v702_v25, %v702_v25 }
 0x564   : > { %780 = vmatmul.bf16.vlgmr.msra.gmra.mxu0 %v703_v26 }
 0x5e1   : > { %v781_v28 = vpop.f32.mrf.mxu0 }
 0x5e2   : > { %v782_v29 = vadd.f32 %v1027_v27, %v781_v28 }
 0x5e4   : > { %v785_v30 = vadd.f32 %v782_v29, %v656_v5 }
 0x5e6   : > { %v788_v31 = vsel %vm500_vm0, %v785_v30, 0.0 }
 0x5e7   : > { %789 = vadd.xlane.f32.xlu2 %v788_v31 }
 0x5e9   : > { %v783_v32 = vpop.f32.mrf.mxu0 }
 0x65a   : > { %v790_v33 = vpop.xlane.xlu2 %789 }
 0x65b   : > { %v791_v34 = vmul.f32 %v790_v33, %v1266_v45 }
 0x65d   : > { %v792_v35 = vsub.f32 %v785_v30, %v791_v34 }
 0x65f   : > { %v793_v36 = vmul.f32 %v792_v35, %v792_v35 }
 0x661   : > { %v794_v37 = vsel %vm500_vm0, %v793_v36, 0.0 }
 0x662   : > { %795 = vadd.xlane.f32.xlu2 %v794_v37 }
 0x6d5   : > { %v796_v38 = vpop.xlane.xlu2 %795 }
 0x6d6   : > { %v797_v39 = vmul.f32 %v796_v38, %v1266_v45  ;;  %v801_v45 = vmul.f32 %v1028_v46, %v792_v35 }
 0x6d8   : > { %v802_v40 = vadd.f32 1e-12, %v797_v39 }
 0x6da   : > { %1040 = vrsqrt.f32 %v802_v40  ;;  %vm809_vm8 = vweird.f32 %v802_v40 }
 0x6e0   : > { %v1041_v41 = vpop.eup %1040 }
 0x6e1   : > { %v804_v42 = vmul.f32 %v1041_v41, %v802_v40  ;;  %vm810_vm7 = vweird.f32 %v1041_v41 }
 0x6e2   : > { %vm811_vm9 = vmor %vm809_vm8, %vm810_vm7 }
 0x6e3   : > { %v805_v43 = vmul.f32 %v1041_v41, %v804_v42 }
 0x6e5   : > { %v806_v44 = vmul.f32 0.5, %v805_v43 }
 0x6e7   : > { %v807_v47 = vsub.f32 1.5, %v806_v44 }
 0x6e9   : > { %v808_v48 = vmul.f32 %v1041_v41, %v807_v47 }
 0x6eb   : > { %v812_v50 = vsel %vm811_vm9, %v1041_v41, %v808_v48 }
 0x6ec   : > { %v813_v51 = vmul.f32 %v812_v50, %v801_v45 }
 0x6ee   : > { %v817_v52 = vadd.f32 %v1029_v49, %v813_v51 }
 0x6f0   : > { %819 = vst.msk [vmem:[%s468_s0] sm:$0x1] %vm818_vm10, %v817_v52 }
 0x6f1   : > { %1069 = shalt.err (!%p1066_p3)
}
 0x6f2   : > { %979 = dma.vmem_to_hbm [thread:$0]  (%p1222_p5), %s832_s27, 16, %s834_s28, %s821_s17  }
 0x6f3 PF: > { %p985_p4 = scmp.ge.s32.totalorder %s1104_s16, 2  ;;  %s845_s22 = sand.u32 1, %s1092_s29  }
 0x6f4   : > { %s846_s0 = scalar_lea.sflag [#allocation3], %s845_s22 }
 0x6f5   : > { %p982_p7 = pnand %p985_p4, %p1226_p6 }
 0x6f7   : > { %p983_p8 = pneg %p982_p7 }
 0x6f9   : > { %1087 = dma.done.wait (%p983_p8), %s846_s0, 16  }
 0x6fa   : > { %1089 = vsyncadd (%p983_p8), %s846_s0, 4294967280  ;;  %s1380_s1 = sld [smem:[#allocation5_spill]]  ;;  %p24_p9 = scmp.ge.s32.totalorder %s1209_s19, 4  }
 0x6fb   : > { %s1381_s15 = sld [smem:[#allocation6_spill]]  ;;  %s1382_s29 = smov %s1096_s30 }
 0x6fc   : > { %s1384_s16 = smov %s1209_s19  ;;  %26 = sbr.rel (!%p24_p9) target bundleno = 6 (0x6), region = 114 }
 0x700   : > { %s1383_s30 = smov %s1380_s1 }
 0x701   :  { %851 = vsyncpa [#allocation3], 1 }
 0x702   :  { %853 = vsyncpa [#allocation3 + $0x1], 1 }

</bundles_post_ra>
